<compile_context>
chip_gen: v5e
topology: v5e:2x2
jax: 0.10.0
libtpu: 0.0.40
codegen_flags: <defaults>
</compile_context>

<pallas_src>
import jax
import jax.numpy as jnp
from jax.experimental import pallas as pl
from jax.experimental.pallas import tpu as pltpu


def _make_mlp_kernel(n_rest):
    """Kernel for: first Linear + ReLU on the concatenated embedding, `n_rest` more
    Linear+ReLU layers, then affine output (as mul + lane-reduce) and sigmoid."""

    def kernel(x_ref, w0_ref, b0_ref, *rest):
        # rest = [w_1, b_1, ..., w_{n_rest}, b_{n_rest}, w_out_row, b_out(SMEM), out]
        out_ref = rest[-1]
        wo_ref = rest[-3]          # (1, last)  f32 — pre-transposed in the wrapper
        bo_ref = rest[-2]          # (1, 1)     f32 scalar in SMEM

        # Layer 0: single MXU dot at K = 2*factor (weights/activations may be bf16;
        # accumulation is f32), bias-add + ReLU on the VPU in f32.
        v = jnp.dot(x_ref[...], w0_ref[...], preferred_element_type=jnp.float32)
        v = jnp.maximum(v + b0_ref[...], 0.0)

        # Remaining hidden layers (static Python unroll).
        for l in range(n_rest):
            w = rest[2 * l][...]       # (in, out)   matmul dtype
            b = rest[2 * l + 1][...]   # (1, out)    f32
            v = jnp.dot(v.astype(w.dtype), w, preferred_element_type=jnp.float32)
            v = jnp.maximum(v + b, 0.0)

        # affine_output: N=1 matmul wastes the MXU -> VPU multiply + XLU reduce.
        logits = jnp.sum(v * wo_ref[...], axis=-1, keepdims=True) + bo_ref[0, 0]
        out_ref[...] = jax.nn.sigmoid(logits).astype(out_ref.dtype)

    return kernel


def ncf_mlp_forward(user_indices, item_indices, params, *,
                    tile_b=1024, matmul_dtype=jnp.bfloat16):
    """Pallas-backed forward pass equivalent to Multi_Layer_Perceptron.forward.

    matmul_dtype: dtype used for MXU operands (bf16 by default; pass jnp.float32
    for exact parity with an f32 reference).
    """
    emb_u, emb_i = params["emb_user"], params["emb_item"]
    factor = emb_u.shape[-1]
    feat = 2 * factor
    batch = user_indices.shape[0]

    # Prefer >= 2 grid steps so v7x's two TensorCores both get work on the
    # "parallel" batch axis.
    if batch > 8 and pl.cdiv(batch, tile_b) < 2:
        tile_b = max(8, 8 * pl.cdiv(pl.cdiv(batch, 2), 8))

    n_tiles = pl.cdiv(batch, tile_b)
    b_pad = n_tiles * tile_b

    # Pad the cheap int32 index vectors instead of the gathered activations; the
    # gather + concat + pad then fuse into one XLA op producing (b_pad, 2*factor).
    if b_pad != batch:
        pad = b_pad - batch
        user_indices = jnp.pad(user_indices, (0, pad))   # index 0 is in-bounds
        item_indices = jnp.pad(item_indices, (0, pad))

    # TODO(synk): fuse this gather into the kernel (scalar-prefetch indices,
    # pl.ANY-space embedding tables + manual DMA) to drop the HBM round trip of x.
    x = jnp.concatenate([emb_u[user_indices], emb_i[item_indices]], axis=-1)
    x = x.astype(matmul_dtype)

    fc_ws = [w.astype(matmul_dtype) for w in params["fc_w"]]      # (in, out)
    fc_bs = [b.astype(jnp.float32) for b in params["fc_b"]]       # (1, out)
    out_w_row = params["out_w"].reshape(1, -1).astype(jnp.float32)  # (1, last)
    out_b = params["out_b"].reshape(1, 1).astype(jnp.float32)       # (1, 1) -> SMEM

    kernel_inputs = [x, fc_ws[0], fc_bs[0]]
    for w, b in zip(fc_ws[1:], fc_bs[1:]):
        kernel_inputs += [w, b]
    kernel_inputs += [out_w_row, out_b]

    # BlockSpecs: batch-tiled activations; VMEM-resident weights (constant maps).
    act_spec = pl.BlockSpec((tile_b, feat), lambda i: (i, 0))

    def const_spec(arr):
        return pl.BlockSpec(arr.shape, lambda i: (0, 0))

    in_specs = [act_spec, const_spec(fc_ws[0]), const_spec(fc_bs[0])]
    for w, b in zip(fc_ws[1:], fc_bs[1:]):
        in_specs += [const_spec(w), const_spec(b)]
    in_specs += [const_spec(out_w_row),
                 pl.BlockSpec(memory_space=pltpu.MemorySpace.SMEM)]

    # Explicit scoped-VMEM budget: 2x (double-buffered inputs + output) plus the
    # widest f32 intermediate, with 2x headroom; clamped to fit every generation.
    def nbytes(a):
        return a.size * a.dtype.itemsize

    act_bytes = tile_b * feat * x.dtype.itemsize
    weight_bytes = sum(nbytes(a) for a in kernel_inputs[1:-1])
    out_bytes = tile_b * 1 * 4
    widest = max(w.shape[1] for w in fc_ws)
    interm_bytes = tile_b * widest * 4
    vmem_budget = 2 * (act_bytes + weight_bytes + out_bytes) + 2 * interm_bytes
    vmem_limit = min(max(2 * vmem_budget, 16 << 20), 48 << 20)

    out_padded = pl.pallas_call(
        _make_mlp_kernel(len(fc_ws) - 1),
        out_shape=jax.ShapeDtypeStruct((b_pad, 1), jnp.float32),
        grid=(n_tiles,),
        in_specs=in_specs,
        out_specs=pl.BlockSpec((tile_b, 1), lambda i: (i, 0)),
        compiler_params=pltpu.CompilerParams(
            dimension_semantics=("parallel",),
            vmem_limit_bytes=int(vmem_limit)),
    )(*kernel_inputs)

    return out_padded[:batch]


def init_params(key, num_users, num_items, factor_num, layers):
    """Deterministic synthetic parameters matching the module's __init__ shapes."""
    keys = jax.random.split(key, 4 + 2 * (len(layers) - 1))
    k_iter = iter(keys)

    params = {
        "emb_user": 0.1 * jax.random.normal(
            next(k_iter), (num_users, factor_num), jnp.float32),
        "emb_item": 0.1 * jax.random.normal(
            next(k_iter), (num_items, factor_num), jnp.float32),
        "fc_w": [],
        "fc_b": [],
    }
    for in_size, out_size in zip(layers[:-1], layers[1:]):
        # stored as (in, out); equals torch Linear weight (out, in) transposed
        params["fc_w"].append(
            0.1 * jax.random.normal(next(k_iter), (in_size, out_size), jnp.float32))
        params["fc_b"].append(
            0.01 * jax.random.normal(next(k_iter), (1, out_size), jnp.float32))
    params["out_w"] = 0.1 * jax.random.normal(
        next(k_iter), (layers[-1], 1), jnp.float32)
    params["out_b"] = 0.01 * jax.random.normal(next(k_iter), (1, 1), jnp.float32)
    return params


def ncf_mlp_reference(user_indices, item_indices, params):
    """Pure-JAX f32 reference for correctness checking."""
    v = jnp.concatenate(
        [params["emb_user"][user_indices], params["emb_item"][item_indices]], axis=-1)
    for w, b in zip(params["fc_w"], params["fc_b"]):
        v = jnp.maximum(v @ w + b, 0.0)
    return jax.nn.sigmoid(v @ params["out_w"] + params["out_b"])


if __name__ == "__main__":
    # Small synthetic config: factor_num=16, layers=[32, 64, 32, 16].
    # batch=300 with tile_b=128 exercises a multi-step grid (3 tiles) + padding.
    num_users, num_items = 10, 20
    factor_num = 16
    layers = [2 * factor_num, 64, 32, 16]
    batch = 300
    tile_b = 128

    key = jax.random.PRNGKey(0)
    k_params, k_u, k_i = jax.random.split(key, 3)

    params = init_params(k_params, num_users, num_items, factor_num, layers)
    user_indices = jax.random.randint(k_u, (batch,), 0, num_users, dtype=jnp.int32)
    item_indices = jax.random.randint(k_i, (batch,), 0, num_items, dtype=jnp.int32)

    ref = ncf_mlp_reference(user_indices, item_indices, params)

    # 1) Exact-parity mode (f32 matmuls) against the f32 reference.
    rating_f32 = ncf_mlp_forward(user_indices, item_indices, params,
                                 tile_b=tile_b, matmul_dtype=jnp.float32)
    rating_f32 = jax.block_until_ready(rating_f32)
    assert rating_f32.shape == (batch, 1)
    assert jnp.allclose(rating_f32, ref, atol=1e-5, rtol=1e-5), "f32 mismatch vs reference"

    # 2) Production mode (bf16 MXU operands, f32 accumulate/epilogue).
    rating_bf16 = ncf_mlp_forward(user_indices, item_indices, params,
                                  tile_b=tile_b, matmul_dtype=jnp.bfloat16)
    rating_bf16 = jax.block_until_ready(rating_bf16)
    assert rating_bf16.shape == (batch, 1)
    assert jnp.allclose(rating_bf16, ref, atol=3e-2, rtol=0.0), "bf16 mismatch vs reference"

    print("KERNEL_OK")
</pallas_src>

<mosaic_0001>
module attributes {stable_mosaic.version = 11 : i64} {
  func.func @kernel(%arg0: i32, %arg1: memref<128x32xf32, #tpu.memory_space<vmem>>, %arg2: memref<32x64xf32, #tpu.memory_space<vmem>>, %arg3: memref<1x64xf32, #tpu.memory_space<vmem>>, %arg4: memref<64x32xf32, #tpu.memory_space<vmem>>, %arg5: memref<1x32xf32, #tpu.memory_space<vmem>>, %arg6: memref<32x16xf32, #tpu.memory_space<vmem>>, %arg7: memref<1x16xf32, #tpu.memory_space<vmem>>, %arg8: memref<1x16xf32, #tpu.memory_space<vmem>>, %arg9: memref<1x1xf32, #tpu.memory_space<smem>>, %arg10: memref<128x1xf32, #tpu.memory_space<vmem>>) attributes {dimension_semantics = [#tpu.dimension_semantics<parallel>], iteration_bounds = array<i64: 3>, scalar_prefetch = 0 : i64, scratch_operands = 0 : i64, tpu.core_type = #tpu.core_type<tc>, window_params = [{transform_indices = @transform_0, window_bounds = array<i64: 128, 32>}, {pipeline_mode = #tpu.pipeline_mode<synchronous>, transform_indices = @transform_1, window_bounds = array<i64: 32, 64>}, {pipeline_mode = #tpu.pipeline_mode<synchronous>, transform_indices = @transform_2, window_bounds = array<i64: 1, 64>}, {pipeline_mode = #tpu.pipeline_mode<synchronous>, transform_indices = @transform_3, window_bounds = array<i64: 64, 32>}, {pipeline_mode = #tpu.pipeline_mode<synchronous>, transform_indices = @transform_4, window_bounds = array<i64: 1, 32>}, {pipeline_mode = #tpu.pipeline_mode<synchronous>, transform_indices = @transform_5, window_bounds = array<i64: 32, 16>}, {pipeline_mode = #tpu.pipeline_mode<synchronous>, transform_indices = @transform_6, window_bounds = array<i64: 1, 16>}, {pipeline_mode = #tpu.pipeline_mode<synchronous>, transform_indices = @transform_7, window_bounds = array<i64: 1, 16>}, {transform_indices = @transform_8, window_bounds = array<i64: 1, 1>}, {transform_indices = @transform_9, window_bounds = array<i64: 128, 1>}]} {
    %c0 = arith.constant 0 : index
    %c0_0 = arith.constant 0 : index
    %0 = vector.load %arg1[%c0, %c0_0] : memref<128x32xf32, #tpu.memory_space<vmem>>, vector<128x32xf32>
    %c0_1 = arith.constant 0 : index
    %c0_2 = arith.constant 0 : index
    %1 = vector.load %arg2[%c0_1, %c0_2] : memref<32x64xf32, #tpu.memory_space<vmem>>, vector<32x64xf32>
    %cst = arith.constant dense<0.000000e+00> : vector<128x64xf32>
    %2 = tpu.matmul %0, %1, %cst {dimension_numbers = #tpu.dot_dimension_numbers<[1], [0], [0], [1], [0, 0, 1, 1], [], []>} : vector<128x32xf32>, vector<32x64xf32>, vector<128x64xf32> -> vector<128x64xf32>
    %c0_3 = arith.constant 0 : index
    %c0_4 = arith.constant 0 : index
    %3 = vector.load %arg3[%c0_3, %c0_4] : memref<1x64xf32, #tpu.memory_space<vmem>>, vector<1x64xf32>
    %4 = vector.broadcast %3 : vector<1x64xf32> to vector<128x64xf32>
    %5 = arith.addf %2, %4 : vector<128x64xf32>
    %cst_5 = arith.constant 0.000000e+00 : f32
    %6 = vector.broadcast %cst_5 : f32 to vector<128x64xf32>
    %7 = arith.maximumf %5, %6 : vector<128x64xf32>
    %c0_6 = arith.constant 0 : index
    %c0_7 = arith.constant 0 : index
    %8 = vector.load %arg4[%c0_6, %c0_7] : memref<64x32xf32, #tpu.memory_space<vmem>>, vector<64x32xf32>
    %c0_8 = arith.constant 0 : index
    %c0_9 = arith.constant 0 : index
    %9 = vector.load %arg5[%c0_8, %c0_9] : memref<1x32xf32, #tpu.memory_space<vmem>>, vector<1x32xf32>
    %cst_10 = arith.constant dense<0.000000e+00> : vector<128x32xf32>
    %10 = tpu.matmul %7, %8, %cst_10 {dimension_numbers = #tpu.dot_dimension_numbers<[1], [0], [0], [1], [0, 0, 1, 1], [], []>} : vector<128x64xf32>, vector<64x32xf32>, vector<128x32xf32> -> vector<128x32xf32>
    %11 = vector.broadcast %9 : vector<1x32xf32> to vector<128x32xf32>
    %12 = arith.addf %10, %11 : vector<128x32xf32>
    %cst_11 = arith.constant 0.000000e+00 : f32
    %13 = vector.broadcast %cst_11 : f32 to vector<128x32xf32>
    %14 = arith.maximumf %12, %13 : vector<128x32xf32>
    %c0_12 = arith.constant 0 : index
    %c0_13 = arith.constant 0 : index
    %15 = vector.load %arg6[%c0_12, %c0_13] : memref<32x16xf32, #tpu.memory_space<vmem>>, vector<32x16xf32>
    %c0_14 = arith.constant 0 : index
    %c0_15 = arith.constant 0 : index
    %16 = vector.load %arg7[%c0_14, %c0_15] : memref<1x16xf32, #tpu.memory_space<vmem>>, vector<1x16xf32>
    %cst_16 = arith.constant dense<0.000000e+00> : vector<128x16xf32>
    %17 = tpu.matmul %14, %15, %cst_16 {dimension_numbers = #tpu.dot_dimension_numbers<[1], [0], [0], [1], [0, 0, 1, 1], [], []>} : vector<128x32xf32>, vector<32x16xf32>, vector<128x16xf32> -> vector<128x16xf32>
    %18 = vector.broadcast %16 : vector<1x16xf32> to vector<128x16xf32>
    %19 = arith.addf %17, %18 : vector<128x16xf32>
    %cst_17 = arith.constant 0.000000e+00 : f32
    %20 = vector.broadcast %cst_17 : f32 to vector<128x16xf32>
    %21 = arith.maximumf %19, %20 : vector<128x16xf32>
    %c0_18 = arith.constant 0 : index
    %c0_19 = arith.constant 0 : index
    %22 = vector.load %arg8[%c0_18, %c0_19] : memref<1x16xf32, #tpu.memory_space<vmem>>, vector<1x16xf32>
    %23 = vector.broadcast %22 : vector<1x16xf32> to vector<128x16xf32>
    %24 = arith.mulf %21, %23 : vector<128x16xf32>
    %cst_20 = arith.constant dense<0.000000e+00> : vector<128xf32>
    %25 = vector.multi_reduction <add>, %24, %cst_20 [1] : vector<128x16xf32> to vector<128xf32>
    %26 = vector.shape_cast %25 : vector<128xf32> to vector<128x1xf32>
    %c0_21 = arith.constant 0 : index
    %c0_22 = arith.constant 0 : index
    %27 = memref.load %arg9[%c0_21, %c0_22] : memref<1x1xf32, #tpu.memory_space<smem>>
    %28 = vector.broadcast %27 : f32 to vector<128x1xf32>
    %29 = arith.addf %26, %28 : vector<128x1xf32>
    %30 = arith.negf %29 : vector<128x1xf32>
    %31 = math.exp %30 : vector<128x1xf32>
    %cst_23 = arith.constant 1.000000e+00 : f32
    %32 = vector.broadcast %cst_23 : f32 to vector<128x1xf32>
    %33 = arith.addf %32, %31 : vector<128x1xf32>
    %34 = arith.divf %32, %33 : vector<128x1xf32>
    %c0_24 = arith.constant 0 : index
    %c0_25 = arith.constant 0 : index
    %35 = vector.load %arg10[%c0_24, %c0_25] : memref<128x1xf32, #tpu.memory_space<vmem>>, vector<128x1xf32>
    tpu.vector_store %arg10[%c0_24, %c0_25], %34 {strides = array<i32>} : memref<128x1xf32, #tpu.memory_space<vmem>>, vector<128x1xf32>,
    return
  }
  func.func @transform_0(%arg0: i32) -> (i32, i32) {
    %c0_i32 = arith.constant 0 : i32
    %c0_i32_0 = arith.constant 0 : i32
    return %arg0, %c0_i32 : i32, i32
  }
  func.func @transform_1(%arg0: i32) -> (i32, i32) {
    %c0_i32 = arith.constant 0 : i32
    %c0_i32_0 = arith.constant 0 : i32
    %c0_i32_1 = arith.constant 0 : i32
    return %c0_i32, %c0_i32_0 : i32, i32
  }
  func.func @transform_2(%arg0: i32) -> (i32, i32) {
    %c0_i32 = arith.constant 0 : i32
    %c0_i32_0 = arith.constant 0 : i32
    %c0_i32_1 = arith.constant 0 : i32
    return %c0_i32, %c0_i32_0 : i32, i32
  }
  func.func @transform_3(%arg0: i32) -> (i32, i32) {
    %c0_i32 = arith.constant 0 : i32
    %c0_i32_0 = arith.constant 0 : i32
    %c0_i32_1 = arith.constant 0 : i32
    return %c0_i32, %c0_i32_0 : i32, i32
  }
  func.func @transform_4(%arg0: i32) -> (i32, i32) {
    %c0_i32 = arith.constant 0 : i32
    %c0_i32_0 = arith.constant 0 : i32
    %c0_i32_1 = arith.constant 0 : i32
    return %c0_i32, %c0_i32_0 : i32, i32
  }
  func.func @transform_5(%arg0: i32) -> (i32, i32) {
    %c0_i32 = arith.constant 0 : i32
    %c0_i32_0 = arith.constant 0 : i32
    %c0_i32_1 = arith.constant 0 : i32
    return %c0_i32, %c0_i32_0 : i32, i32
  }
  func.func @transform_6(%arg0: i32) -> (i32, i32) {
    %c0_i32 = arith.constant 0 : i32
    %c0_i32_0 = arith.constant 0 : i32
    %c0_i32_1 = arith.constant 0 : i32
    return %c0_i32, %c0_i32_0 : i32, i32
  }
  func.func @transform_7(%arg0: i32) -> (i32, i32) {
    %c0_i32 = arith.constant 0 : i32
    %c0_i32_0 = arith.constant 0 : i32
    %c0_i32_1 = arith.constant 0 : i32
    return %c0_i32, %c0_i32_0 : i32, i32
  }
  func.func @transform_8(%arg0: i32) -> (i32, i32) {
    %c0_i32 = arith.constant 0 : i32
    %c0_i32_0 = arith.constant 0 : i32
    %c0_i32_1 = arith.constant 0 : i32
    return %c0_i32, %c0_i32_0 : i32, i32
  }
  func.func @transform_9(%arg0: i32) -> (i32, i32) {
    %c0_i32 = arith.constant 0 : i32
    %c0_i32_0 = arith.constant 0 : i32
    return %arg0, %c0_i32 : i32, i32
  }
}

</mosaic_0001>

<bundles_post_ra>
// kernel: tpu_custom_call.1
= control target key start
LH: loop header
LB: loop body
LE: loop exit
PB: predicated region body
PF: predicated region fallthrough
CT: control target
= control target key end

     0   :  { %s1462_s11 = smov 0   ;;  %s1734_s0 = inlined_call_operand.vmem [shape: f32[384,32], index: 0, kind: input, shape index: {}]   ;;  %s1735_s1 = inlined_call_operand.vmem [shape: f32[32,64], index: 1, kind: input, shape index: {}]   ;;  %s1736_s2 = inlined_call_operand.vmem [shape: f32[1,64], index: 2, kind: input, shape index: {}]   ;;  %s1737_s3 = inlined_call_operand.vmem [shape: f32[64,32], index: 3, kind: input, shape index: {}]   ;;  %s1738_s4 = inlined_call_operand.vmem [shape: f32[1,32], index: 4, kind: input, shape index: {}]   ;;  %s1739_s5 = inlined_call_operand.vmem [shape: f32[32,16], index: 5, kind: input, shape index: {}]   ;;  %s1740_s6 = inlined_call_operand.vmem [shape: f32[1,16], index: 6, kind: input, shape index: {}]   ;;  %s1741_s7 = inlined_call_operand.vmem [shape: f32[1,16], index: 7, kind: input, shape index: {}]   ;;  %s1742_s8 = inlined_call_operand.<no memory space> [shape: f32[1,1], index: 8, kind: input, shape index: {}]   ;;  %s1743_s9 = inlined_call_operand.vmem [shape: f32[384,1], index: 9, kind: output, shape index: {}]  }
   0x1   :  { %14 = sst [smem:[#allocation2]] %s1742_s8 }
   0x2 LB: > { %s1234_s12 = sadd.s32 4294967295, %s1407_s11   ;;  %p1238_p0 = scmp.ge.s32.totalorder %s1407_s11, 1  ;;  %s1407_s11 = sphi %s1462_s11, %s20_s11  }
   0x3   : > { %p289_p1 = scmp.lt.s32.totalorder %s1407_s11, 4 }
   0x5   : > { %p290_p2 = pnand %p1238_p0, %p289_p1 }
   0x6   : > { %s1239_s16 = sshll.u32 (!%p290_p2), %s1234_s12, 4  ;;  %s839_s18 = sld [smem:[#allocation2]] (!%p290_p2) }
   0x7   : > { %293 = sbr.rel (%p290_p2) target bundleno = 692 (0x2b4), region = 56  ;;  %p326_p3 = scmp.lt.s32.totalorder (!%p290_p2), %s1239_s16, 47 }
   0xc   : > { %v356_v0 = vld [vmem:[%s1735_s1 + $0x18] sm:$0xff]  ;;  %v355_v1 = vld [vmem:[%s1735_s1 + $0x10] sm:$0xff]  ;;  %v354_v2 = vld [vmem:[%s1735_s1 + $0x8] sm:$0xff]  ;;  %s1745_s16 = smov (!%p326_p3, %s1239_s16), 47  ;;  %vm361_vm0 = vcmask 261120   ;;  %vm503_vm1 = vcmask 523264  }
   0xd   : > { %422 = vmatpush.msra.mxu0 %v356_v0  ;;  %1309 = vmatpush.msra.mxu3 %v356_v0  ;;  %v353_v3 = vld [vmem:[%s1735_s1] sm:$0xff]  ;;  %s1240_s21 = sshll.u32 %s1745_s16, 3  ;;  %v498_v14 = vld [vmem:[%s1737_s3 + $0x38] sm:$0xff]  ;;  %v497_v15 = vld [vmem:[%s1737_s3 + $0x30] sm:$0xff]  ;;  %vm790_vm2 = vcmask 130048   ;;  %vm1161_vm5 = vcmask 7168  }
   0xe   : > { %s1490_s24 = scalar_lea.vmem %s1734_s0, %s1240_s21  ;;  %560 = vmatpush.msra.mxu1 %v498_v14  ;;  %v496_v16 = vld [vmem:[%s1737_s3 + $0x28] sm:$0xff]  ;;  %v495_v18 = vld [vmem:[%s1737_s3 + $0x20] sm:$0xff]  ;;  %v494_v20 = vld [vmem:[%s1737_s3 + $0x18] sm:$0xff]  ;;  %s1685_s22 = scalar_lea.vmem %s1743_s9, %s1240_s21 }
   0xf   : > { %423 = vmatpush.msra.mxu0 %v355_v1  ;;  %1310 = vmatpush.msra.mxu3 %v355_v1  ;;  %v337_v4 = vld [vmem:[%s1490_s24] sm:$0xff]  ;;  %v338_v5 = vld [vmem:[%s1490_s24 + $0x8] sm:$0xff]  ;;  %v339_v6 = vld [vmem:[%s1490_s24 + $0x10] sm:$0xff] }
  0x10   : > { %v340_v7 = vld [vmem:[%s1490_s24 + $0x18] sm:$0xff]  ;;  %v341_v8 = vld [vmem:[%s1490_s24 + $0x20] sm:$0xff]  ;;  %v342_v9 = vld [vmem:[%s1490_s24 + $0x28] sm:$0xff]  ;;  %561 = vmatpush.msra.mxu1 %v497_v15 }
  0x11   : > { %424 = vmatpush.msra.mxu0 %v354_v2  ;;  %1311 = vmatpush.msra.mxu3 %v354_v2  ;;  %v343_v10 = vld [vmem:[%s1490_s24 + $0x30] sm:$0xff]  ;;  %v344_v11 = vld [vmem:[%s1490_s24 + $0x38] sm:$0xff]  ;;  %v345_v12 = vld [vmem:[%s1490_s24 + $0x40] sm:$0xff] }
  0x12   : > { %v350_v13 = vld [vmem:[%s1490_s24 + $0x68] sm:$0xff]  ;;  %v351_v19 = vld [vmem:[%s1490_s24 + $0x70] sm:$0xff]  ;;  %562 = vmatpush.msra.mxu1 %v496_v16  ;;  %v352_v22 = vld [vmem:[%s1490_s24 + $0x78] sm:$0xff] }
  0x13   : > { %425 = vmatpush.msra.mxu0 %v353_v3  ;;  %1312 = vmatpush.msra.mxu3 %v353_v3  ;;  %v346_v17 = vld [vmem:[%s1490_s24 + $0x48] sm:$0xff]  ;;  %v347_v21 = vld [vmem:[%s1490_s24 + $0x50] sm:$0xff]  ;;  %v348_v23 = vld [vmem:[%s1490_s24 + $0x58] sm:$0xff] }
  0x14   : > { %1243 = vmatmul.msk.f32.vlgmr.msra.gmra.mxu0 %vm361_vm0, %v337_v4  ;;  %1256 = vmatmul.msk.f32.vlgmr.msra.gmra.mxu3 %vm361_vm0, %v350_v13  ;;  %v493_v24 = vld [vmem:[%s1737_s3 + $0x10] sm:$0xff]  ;;  %v349_v25 = vld [vmem:[%s1490_s24 + $0x60] sm:$0xff]  ;;  %v492_v26 = vld [vmem:[%s1737_s3 + $0x8] sm:$0xff] }
  0x15   : > { %1313 = vmatpush.msrb.mxu3 %v498_v14  ;;  %563 = vmatpush.msra.mxu1 %v495_v18  ;;  %v491_v27 = vld [vmem:[%s1737_s3] sm:$0xff]  ;;  %v636_v1 = vld [vmem:[%s1739_s5 + $0x18] sm:$0xff] }
  0x16   : > { %v1551_v28 = vld [vmem:[%s1736_s2] ss:$0 sm:$0xff]  ;;  %701 = vmatpush.msra.mxu2 %v636_v1 }
  0x17   : > { %1314 = vmatpush.msrb.mxu3 %v497_v15  ;;  %564 = vmatpush.msra.mxu1 %v494_v20 }
  0x19   : > { %1315 = vmatpush.msrb.mxu3 %v496_v16  ;;  %565 = vmatpush.msra.mxu1 %v493_v24 }
  0x1b   : > { %1316 = vmatpush.msrb.mxu3 %v495_v18  ;;  %566 = vmatpush.msra.mxu1 %v492_v26 }
  0x1c   : > { %1244 = vmatmul.msk.f32.gmra.mxu0 %vm361_vm0, %v338_v5  ;;  %1257 = vmatmul.msk.f32.gmra.mxu3 %vm361_vm0, %v351_v19  ;;  %v635_v5 = vld [vmem:[%s1739_s5 + $0x10] sm:$0xff] }
  0x1d   : > { %1317 = vmatpush.msrb.mxu3 %v494_v20  ;;  %567 = vmatpush.msra.mxu1 %v491_v27 }
  0x1e   : > { %702 = vmatpush.msra.mxu2 %v635_v5 }
  0x1f   : > { %1318 = vmatpush.msrb.mxu3 %v493_v24 }
  0x21   : > { %1319 = vmatpush.msrb.mxu3 %v492_v26 }
  0x23   : > { %1320 = vmatpush.msrb.mxu3 %v491_v27 }
  0x24   : > { %1245 = vmatmul.msk.f32.gmra.mxu0 %vm361_vm0, %v339_v6  ;;  %1258 = vmatmul.msk.f32.gmra.mxu3 %vm361_vm0, %v352_v22 }
  0x25   : > { %1321 = vmatpush.msra.mxu3 %v636_v1 }
  0x27   : > { %1322 = vmatpush.msra.mxu3 %v635_v5  ;;  %v1625_v5 = vld [vmem:[%s1741_s7] ss:$0 sm:$0xff] }
  0x2c   : > { %1246 = vmatmul.msk.f32.gmra.mxu0 %vm361_vm0, %v340_v7  ;;  %v634_v7 = vld [vmem:[%s1739_s5 + $0x8] sm:$0xff] }
  0x2d   : > { %703 = vmatpush.msra.mxu2 %v634_v7  ;;  %1323 = vmatpush.msra.mxu3 %v634_v7 }
  0x34   : > { %1247 = vmatmul.msk.f32.gmra.mxu0 %vm361_vm0, %v341_v8 }
  0x3c   : > { %1248 = vmatmul.msk.f32.gmra.mxu0 %vm361_vm0, %v342_v9  ;;  %v633_v9 = vld [vmem:[%s1739_s5] sm:$0xff] }
  0x3d   : > { %704 = vmatpush.msra.mxu2 %v633_v9  ;;  %1324 = vmatpush.msra.mxu3 %v633_v9 }
  0x44   : > { %1249 = vmatmul.msk.f32.gmra.mxu0 %vm361_vm0, %v343_v10 }
  0x4c   : > { %1250 = vmatmul.msk.f32.gmra.mxu0 %vm361_vm0, %v344_v11 }
  0x54   : > { %1251 = vmatmul.msk.f32.gmra.mxu0 %vm361_vm0, %v345_v12 }
  0x5c   : > { %1252 = vmatmul.msk.f32.gmra.mxu0 %vm361_vm0, %v346_v17  ;;  %v1334_v17 = vld [vmem:[%s1738_s4] ss:$0 sm:$0xff] }
  0x64   : > { %1253 = vmatmul.msk.f32.gmra.mxu0 %vm361_vm0, %v347_v21 }
  0x6c   : > { %1254 = vmatmul.msk.f32.gmra.mxu0 %vm361_vm0, %v348_v23 }
  0x74   : > { %1255 = vmatmul.msk.f32.gmra.mxu0 %vm361_vm0, %v349_v25 }
  0x91   : > { %v427_v29 = vpop.f32.mrf.mxu0 }
  0x92   : > { %v428_v30 = vadd.f32 %v1551_v28, %v427_v29 }
  0x94   : > { %v475_v31 = vmax.f32 %v428_v30, 0.0 }
  0x96   : > { %1259 = vmatmul.msk.f32.vlgmr.msra.gmra.mxu1 %vm503_vm1, %v475_v31 }
  0x97   : > { %v466_v2 = vpop.f32.mrf.mxu3 }
  0x98   : > { %v467_v8 = vadd.f32 %v1551_v28, %v466_v2  ;;  %v1619_v2 = vld [vmem:[%s1740_s6] ss:$0 sm:$0xff] }
  0x99   : > { %v430_v32 = vpop.f32.mrf.mxu0 }
  0x9a   : > { %v431_v33 = vadd.f32 %v1551_v28, %v430_v32  ;;  %v488_v11 = vmax.f32 %v467_v8, 0.0 }
  0x9c   : > { %v476_v34 = vmax.f32 %v431_v33, 0.0 }
  0x9e   : > { %1260 = vmatmul.msk.f32.gmra.mxu1 %vm503_vm1, %v476_v34 }
  0x9f   : > { %v469_v10 = vpop.f32.mrf.mxu3 }
  0xa0   : > { %v470_v12 = vadd.f32 %v1551_v28, %v469_v10 }
  0xa1   : > { %v433_v35 = vpop.f32.mrf.mxu0 }
  0xa2   : > { %v434_v36 = vadd.f32 %v1551_v28, %v433_v35  ;;  %v489_v13 = vmax.f32 %v470_v12, 0.0 }
  0xa4   : > { %v477_v37 = vmax.f32 %v434_v36, 0.0 }
  0xa6   : > { %1261 = vmatmul.msk.f32.gmra.mxu1 %vm503_vm1, %v477_v37 }
  0xa7   : > { %v472_v14 = vpop.f32.mrf.mxu3 }
  0xa8   : > { %v473_v15 = vadd.f32 %v1551_v28, %v472_v14 }
  0xa9   : > { %v436_v38 = vpop.f32.mrf.mxu0 }
  0xaa   : > { %v437_v39 = vadd.f32 %v1551_v28, %v436_v38  ;;  %v490_v16 = vmax.f32 %v473_v15, 0.0 }
  0xac   : > { %v478_v40 = vmax.f32 %v437_v39, 0.0 }
  0xae   : > { %1262 = vmatmul.msk.f32.gmra.mxu1 %vm503_vm1, %v478_v40 }
  0xb1   : > { %v439_v41 = vpop.f32.mrf.mxu0 }
  0xb2   : > { %v440_v42 = vadd.f32 %v1551_v28, %v439_v41 }
  0xb4   : > { %v479_v43 = vmax.f32 %v440_v42, 0.0 }
  0xb6   : > { %1263 = vmatmul.msk.f32.gmra.mxu1 %vm503_vm1, %v479_v43 }
  0xb9   : > { %v442_v44 = vpop.f32.mrf.mxu0 }
  0xba   : > { %v443_v45 = vadd.f32 %v1551_v28, %v442_v44 }
  0xbc   : > { %v480_v46 = vmax.f32 %v443_v45, 0.0 }
  0xbe   : > { %1264 = vmatmul.msk.f32.gmra.mxu1 %vm503_vm1, %v480_v46 }
  0xc1   : > { %v445_v47 = vpop.f32.mrf.mxu0 }
  0xc2   : > { %v446_v48 = vadd.f32 %v1551_v28, %v445_v47 }
  0xc4   : > { %v481_v49 = vmax.f32 %v446_v48, 0.0 }
  0xc6   : > { %1265 = vmatmul.msk.f32.gmra.mxu1 %vm503_vm1, %v481_v49 }
  0xc9   : > { %v448_v50 = vpop.f32.mrf.mxu0 }
  0xca   : > { %v449_v51 = vadd.f32 %v1551_v28, %v448_v50 }
  0xcc   : > { %v482_v52 = vmax.f32 %v449_v51, 0.0 }
  0xce   : > { %1266 = vmatmul.msk.f32.gmra.mxu1 %vm503_vm1, %v482_v52 }
  0xd1   : > { %v451_v53 = vpop.f32.mrf.mxu0 }
  0xd2   : > { %v452_v54 = vadd.f32 %v1551_v28, %v451_v53 }
  0xd4   : > { %v483_v55 = vmax.f32 %v452_v54, 0.0 }
  0xd6   : > { %1267 = vmatmul.msk.f32.gmra.mxu1 %vm503_vm1, %v483_v55 }
  0xd9   : > { %v454_v56 = vpop.f32.mrf.mxu0 }
  0xda   : > { %v455_v57 = vadd.f32 %v1551_v28, %v454_v56 }
  0xdc   : > { %v484_v58 = vmax.f32 %v455_v57, 0.0 }
  0xde   : > { %1268 = vmatmul.msk.f32.gmra.mxu1 %vm503_vm1, %v484_v58 }
  0xe1   : > { %v457_v59 = vpop.f32.mrf.mxu0 }
  0xe2   : > { %v458_v60 = vadd.f32 %v1551_v28, %v457_v59 }
  0xe4   : > { %v485_v61 = vmax.f32 %v458_v60, 0.0 }
  0xe6   : > { %1269 = vmatmul.msk.f32.gmra.mxu1 %vm503_vm1, %v485_v61 }
  0xe9   : > { %v460_v62 = vpop.f32.mrf.mxu0 }
  0xea   : > { %v461_v63 = vadd.f32 %v1551_v28, %v460_v62 }
  0xec   : > { %v486_v0 = vmax.f32 %v461_v63, 0.0 }
  0xee   : > { %1270 = vmatmul.msk.f32.gmra.mxu1 %vm503_vm1, %v486_v0 }
  0xf1   : > { %v463_v3 = vpop.f32.mrf.mxu0 }
  0xf2   : > { %v464_v4 = vadd.f32 %v1551_v28, %v463_v3 }
  0xf4   : > { %v487_v6 = vmax.f32 %v464_v4, 0.0 }
  0xf6   : > { %1271 = vmatmul.msk.f32.vlgmr.msrb.gmra.mxu3 %vm503_vm1, %v487_v6 }
  0xfe   : > { %1272 = vmatmul.msk.f32.gmra.mxu3 %vm503_vm1, %v488_v11 }
 0x106   : > { %1273 = vmatmul.msk.f32.gmra.mxu3 %vm503_vm1, %v489_v13 }
 0x10e   : > { %1274 = vmatmul.msk.f32.gmra.mxu3 %vm503_vm1, %v490_v16 }
 0x113   : > { %v569_v18 = vpop.f32.mrf.mxu1 }
 0x114   : > { %v570_v19 = vadd.f32 %v1334_v17, %v569_v18 }
 0x116   : > { %v617_v20 = vmax.f32 %v570_v19, 0.0 }
 0x118   : > { %1275 = vmatmul.msk.f32.vlgmr.msra.gmra.mxu2 %vm361_vm0, %v617_v20 }
 0x11b   : > { %v572_v21 = vpop.f32.mrf.mxu1 }
 0x11c   : > { %v573_v22 = vadd.f32 %v1334_v17, %v572_v21 }
 0x11e   : > { %v618_v23 = vmax.f32 %v573_v22, 0.0 }
 0x120   : > { %1276 = vmatmul.msk.f32.gmra.mxu2 %vm361_vm0, %v618_v23 }
 0x123   : > { %v575_v24 = vpop.f32.mrf.mxu1 }
 0x124   : > { %v576_v25 = vadd.f32 %v1334_v17, %v575_v24 }
 0x126   : > { %v619_v26 = vmax.f32 %v576_v25, 0.0 }
 0x128   : > { %1277 = vmatmul.msk.f32.gmra.mxu2 %vm361_vm0, %v619_v26 }
 0x12b   : > { %v578_v27 = vpop.f32.mrf.mxu1 }
 0x12c   : > { %v579_v28 = vadd.f32 %v1334_v17, %v578_v27 }
 0x12e   : > { %v620_v29 = vmax.f32 %v579_v28, 0.0 }
 0x130   : > { %1278 = vmatmul.msk.f32.gmra.mxu2 %vm361_vm0, %v620_v29 }
 0x133   : > { %v581_v30 = vpop.f32.mrf.mxu1 }
 0x134   : > { %v582_v31 = vadd.f32 %v1334_v17, %v581_v30 }
 0x136   : > { %v621_v32 = vmax.f32 %v582_v31, 0.0 }
 0x138   : > { %1279 = vmatmul.msk.f32.gmra.mxu2 %vm361_vm0, %v621_v32 }
 0x13b   : > { %v584_v33 = vpop.f32.mrf.mxu1 }
 0x13c   : > { %v585_v34 = vadd.f32 %v1334_v17, %v584_v33 }
 0x13e   : > { %v622_v35 = vmax.f32 %v585_v34, 0.0 }
 0x140   : > { %1280 = vmatmul.msk.f32.gmra.mxu2 %vm361_vm0, %v622_v35 }
 0x143   : > { %v587_v36 = vpop.f32.mrf.mxu1 }
 0x144   : > { %v588_v37 = vadd.f32 %v1334_v17, %v587_v36 }
 0x146   : > { %v623_v38 = vmax.f32 %v588_v37, 0.0 }
 0x148   : > { %1281 = vmatmul.msk.f32.gmra.mxu2 %vm361_vm0, %v623_v38 }
 0x14b   : > { %v590_v39 = vpop.f32.mrf.mxu1 }
 0x14c   : > { %v591_v40 = vadd.f32 %v1334_v17, %v590_v39 }
 0x14e   : > { %v624_v41 = vmax.f32 %v591_v40, 0.0 }
 0x150   : > { %1282 = vmatmul.msk.f32.gmra.mxu2 %vm361_vm0, %v624_v41 }
 0x153   : > { %v593_v42 = vpop.f32.mrf.mxu1 }
 0x154   : > { %v594_v43 = vadd.f32 %v1334_v17, %v593_v42 }
 0x156   : > { %v625_v44 = vmax.f32 %v594_v43, 0.0 }
 0x158   : > { %1283 = vmatmul.msk.f32.gmra.mxu2 %vm361_vm0, %v625_v44 }
 0x15b   : > { %v596_v45 = vpop.f32.mrf.mxu1 }
 0x15c   : > { %v597_v46 = vadd.f32 %v1334_v17, %v596_v45 }
 0x15e   : > { %v626_v47 = vmax.f32 %v597_v46, 0.0 }
 0x160   : > { %1284 = vmatmul.msk.f32.gmra.mxu2 %vm361_vm0, %v626_v47 }
 0x163   : > { %v599_v48 = vpop.f32.mrf.mxu1 }
 0x164   : > { %v600_v49 = vadd.f32 %v1334_v17, %v599_v48 }
 0x166   : > { %v627_v50 = vmax.f32 %v600_v49, 0.0 }
 0x168   : > { %1285 = vmatmul.msk.f32.gmra.mxu2 %vm361_vm0, %v627_v50 }
 0x16b   : > { %v602_v51 = vpop.f32.mrf.mxu1 }
 0x16c   : > { %v603_v52 = vadd.f32 %v1334_v17, %v602_v51 }
 0x16e   : > { %v628_v53 = vmax.f32 %v603_v52, 0.0 }
 0x170   : > { %1286 = vmatmul.msk.f32.gmra.mxu2 %vm361_vm0, %v628_v53 }
 0x179   : > { %v605_v54 = vpop.f32.mrf.mxu3 }
 0x17a   : > { %v606_v55 = vadd.f32 %v1334_v17, %v605_v54 }
 0x17c   : > { %v629_v56 = vmax.f32 %v606_v55, 0.0 }
 0x17e   : > { %1287 = vmatmul.msk.f32.gmra.mxu2 %vm361_vm0, %v629_v56 }
 0x181   : > { %v608_v57 = vpop.f32.mrf.mxu3 }
 0x182   : > { %v609_v58 = vadd.f32 %v1334_v17, %v608_v57 }
 0x184   : > { %v630_v59 = vmax.f32 %v609_v58, 0.0 }
 0x186   : > { %1288 = vmatmul.msk.f32.vlgmr.msra.gmra.mxu3 %vm361_vm0, %v630_v59 }
 0x189   : > { %v611_v60 = vpop.f32.mrf.mxu3 }
 0x18a   : > { %v612_v61 = vadd.f32 %v1334_v17, %v611_v60 }
 0x18c   : > { %v631_v62 = vmax.f32 %v612_v61, 0.0 }
 0x18e   : > { %1289 = vmatmul.msk.f32.gmra.mxu3 %vm361_vm0, %v631_v62 }
 0x191   : > { %v614_v63 = vpop.f32.mrf.mxu3 }
 0x192   : > { %v615_v0 = vadd.f32 %v1334_v17, %v614_v63 }
 0x194   : > { %v632_v1 = vmax.f32 %v615_v0, 0.0 }
 0x196   : > { %1290 = vmatmul.msk.f32.gmra.mxu3 %vm361_vm0, %v632_v1 }
 0x19b   : > { %v706_v3 = vpop.f32.mrf.mxu2 }
 0x19c   : > { %v707_v4 = vadd.f32 %v1619_v2, %v706_v3 }
 0x19e   : > { %v754_v6 = vmax.f32 %v707_v4, 0.0 }
 0x1a0   : > { %v774_v7 = vmul.f32 %v1625_v5, %v754_v6 }
 0x1a2   : > { %v791_v8 = vsel %vm790_vm2, %v774_v7, 0.0 }
 0x1a3   : > { %v709_v9 = vpop.f32.mrf.mxu2  ;;  %792 = vadd.xlane.f32.xlu0 %v791_v8 }
 0x1a4   : > { %v710_v10 = vadd.f32 %v1619_v2, %v709_v9 }
 0x1a6   : > { %v755_v11 = vmax.f32 %v710_v10, 0.0 }
 0x1a8   : > { %v775_v12 = vmul.f32 %v1625_v5, %v755_v11 }
 0x1aa   : > { %v794_v13 = vsel %vm790_vm2, %v775_v12, 0.0 }
 0x1ab   : > { %v712_v14 = vpop.f32.mrf.mxu2  ;;  %795 = vadd.xlane.f32.xlu0 %v794_v13 }
 0x1ac   : > { %v713_v15 = vadd.f32 %v1619_v2, %v712_v14 }
 0x1ae   : > { %v756_v16 = vmax.f32 %v713_v15, 0.0  ;;  %v1669_v15 = vstv %s839_s18 }
 0x1b0   : > { %v776_v17 = vmul.f32 %v1625_v5, %v756_v16 }
 0x1b2   : > { %v797_v18 = vsel %vm790_vm2, %v776_v17, 0.0 }
 0x1b3   : > { %v715_v19 = vpop.f32.mrf.mxu2  ;;  %798 = vadd.xlane.f32.xlu1 %v797_v18 }
 0x1b4   : > { %v716_v20 = vadd.f32 %v1619_v2, %v715_v19 }
 0x1b6   : > { %v757_v21 = vmax.f32 %v716_v20, 0.0 }
 0x1b8   : > { %v777_v22 = vmul.f32 %v1625_v5, %v757_v21 }
 0x1ba   : > { %v800_v23 = vsel %vm790_vm2, %v777_v22, 0.0 }
 0x1bb   : > { %v718_v24 = vpop.f32.mrf.mxu2  ;;  %801 = vadd.xlane.f32.xlu1 %v800_v23 }
 0x1bc   : > { %v719_v25 = vadd.f32 %v1619_v2, %v718_v24 }
 0x1be   : > { %v758_v26 = vmax.f32 %v719_v25, 0.0 }
 0x1c0   : > { %v778_v27 = vmul.f32 %v1625_v5, %v758_v26 }
 0x1c2   : > { %v803_v28 = vsel %vm790_vm2, %v778_v27, 0.0 }
 0x1c3   : > { %v721_v29 = vpop.f32.mrf.mxu2  ;;  %804 = vadd.xlane.f32.xlu2 %v803_v28 }
 0x1c4   : > { %v722_v30 = vadd.f32 %v1619_v2, %v721_v29 }
 0x1c6   : > { %v759_v31 = vmax.f32 %v722_v30, 0.0 }
 0x1c8   : > { %v779_v32 = vmul.f32 %v1625_v5, %v759_v31 }
 0x1ca   : > { %v806_v33 = vsel %vm790_vm2, %v779_v32, 0.0 }
 0x1cb   : > { %v724_v34 = vpop.f32.mrf.mxu2  ;;  %807 = vadd.xlane.f32.xlu2 %v806_v33 }
 0x1cc   : > { %v725_v35 = vadd.f32 %v1619_v2, %v724_v34 }
 0x1ce   : > { %v760_v36 = vmax.f32 %v725_v35, 0.0 }
 0x1d0   : > { %v780_v37 = vmul.f32 %v1625_v5, %v760_v36 }
 0x1d2   : > { %v809_v38 = vsel %vm790_vm2, %v780_v37, 0.0 }
 0x1d3   : > { %v727_v39 = vpop.f32.mrf.mxu2  ;;  %810 = vadd.xlane.f32.xlu0 %v809_v38 }
 0x1d4   : > { %v728_v40 = vadd.f32 %v1619_v2, %v727_v39 }
 0x1d6   : > { %v761_v41 = vmax.f32 %v728_v40, 0.0 }
 0x1d8   : > { %v781_v42 = vmul.f32 %v1625_v5, %v761_v41 }
 0x1da   : > { %v812_v43 = vsel %vm790_vm2, %v781_v42, 0.0 }
 0x1db   : > { %v730_v44 = vpop.f32.mrf.mxu2  ;;  %813 = vadd.xlane.f32.xlu1 %v812_v43 }
 0x1dc   : > { %v731_v45 = vadd.f32 %v1619_v2, %v730_v44 }
 0x1de   : > { %v762_v46 = vmax.f32 %v731_v45, 0.0 }
 0x1e0   : > { %v782_v47 = vmul.f32 %v1625_v5, %v762_v46 }
 0x1e2   : > { %v815_v48 = vsel %vm790_vm2, %v782_v47, 0.0 }
 0x1e3   : > { %v733_v49 = vpop.f32.mrf.mxu2  ;;  %816 = vadd.xlane.f32.xlu2 %v815_v48 }
 0x1e4   : > { %v734_v50 = vadd.f32 %v1619_v2, %v733_v49 }
 0x1e6   : > { %v763_v51 = vmax.f32 %v734_v50, 0.0 }
 0x1e8   : > { %v783_v52 = vmul.f32 %v1625_v5, %v763_v51 }
 0x1ea   : > { %v818_v53 = vsel %vm790_vm2, %v783_v52, 0.0 }
 0x1eb   : > { %v736_v54 = vpop.f32.mrf.mxu2  ;;  %819 = vadd.xlane.f32.xlu0 %v818_v53 }
 0x1ec   : > { %v737_v55 = vadd.f32 %v1619_v2, %v736_v54 }
 0x1ee   : > { %v764_v56 = vmax.f32 %v737_v55, 0.0 }
 0x1f0   : > { %v784_v57 = vmul.f32 %v1625_v5, %v764_v56 }
 0x1f2   : > { %v821_v58 = vsel %vm790_vm2, %v784_v57, 0.0 }
 0x1f3   : > { %v739_v59 = vpop.f32.mrf.mxu2  ;;  %822 = vadd.xlane.f32.xlu1 %v821_v58 }
 0x1f4   : > { %v740_v60 = vadd.f32 %v1619_v2, %v739_v59 }
 0x1f6   : > { %v765_v61 = vmax.f32 %v740_v60, 0.0 }
 0x1f8   : > { %v785_v62 = vmul.f32 %v1625_v5, %v765_v61 }
 0x1fa   : > { %v824_v63 = vsel %vm790_vm2, %v785_v62, 0.0 }
 0x1fb   : > { %825 = vadd.xlane.f32.xlu2 %v824_v63 }
 0x201   : > { %v742_v0 = vpop.f32.mrf.mxu2 }
 0x202   : > { %v743_v1 = vadd.f32 %v1619_v2, %v742_v0 }
 0x204   : > { %v766_v3 = vmax.f32 %v743_v1, 0.0 }
 0x206   : > { %v786_v4 = vmul.f32 %v1625_v5, %v766_v3 }
 0x208   : > { %v827_v6 = vsel %vm790_vm2, %v786_v4, 0.0 }
 0x209   : > { %v745_v7 = vpop.f32.mrf.mxu3  ;;  %828 = vadd.xlane.f32.xlu0 %v827_v6 }
 0x20a   : > { %v746_v8 = vadd.f32 %v1619_v2, %v745_v7 }
 0x20c   : > { %v767_v9 = vmax.f32 %v746_v8, 0.0 }
 0x20e   : > { %v787_v10 = vmul.f32 %v1625_v5, %v767_v9 }
 0x210   : > { %v830_v11 = vsel %vm790_vm2, %v787_v10, 0.0 }
 0x211   : > { %v748_v12 = vpop.f32.mrf.mxu3  ;;  %831 = vadd.xlane.f32.xlu1 %v830_v11 }
 0x212   : > { %v749_v13 = vadd.f32 %v1619_v2, %v748_v12 }
 0x214   : > { %v768_v14 = vmax.f32 %v749_v13, 0.0 }
 0x216   : > { %v793_v16 = vpop.xlane.xlu0 %792  ;;  %v788_v17 = vmul.f32 %v1625_v5, %v768_v14 }
 0x217   : > { %v841_v18 = vadd.f32 %v1669_v15, %v793_v16 }
 0x218   : > { %v833_v19 = vsel %vm790_vm2, %v788_v17, 0.0 }
 0x219   : > { %v1291_v20 = vmul.f32 -1.442695, %v841_v18  ;;  %v751_v21 = vpop.f32.mrf.mxu3  ;;  %834 = vadd.xlane.f32.xlu2 %v833_v19 }
 0x21a   : > { %v752_v22 = vadd.f32 %v1619_v2, %v751_v21 }
 0x21b   : > { %1337 = vpow2.f32 %v1291_v20 }
 0x21c   : > { %v769_v23 = vmax.f32 %v752_v22, 0.0 }
 0x21e   : > { %v796_v24 = vpop.xlane.xlu0 %795  ;;  %v789_v25 = vmul.f32 %v1625_v5, %v769_v23 }
 0x21f   : > { %v842_v26 = vadd.f32 %v1669_v15, %v796_v24 }
 0x220   : > { %v836_v27 = vsel %vm790_vm2, %v789_v25, 0.0 }
 0x221   : > { %v1338_v28 = vpop.eup %1337  ;;  %v1292_v29 = vmul.f32 -1.442695, %v842_v26  ;;  %837 = vadd.xlane.f32.xlu0 %v836_v27 }
 0x222   : > { %v905_v30 = vadd.f32 1.0, %v1338_v28 }
 0x223   : > { %1339 = vpow2.f32 %v1292_v29 }
 0x224   : > { %1341 = vrcp.f32 %v905_v30  ;;  %v932_v37 = vand.u32 2147483648, %v905_v30  ;;  %v930_v40 = vand.u32 2147483647, %v905_v30  ;;  %vm926_vm4 = vweird.f32 %v905_v30 }
 0x226   : > { %v799_v31 = vpop.xlane.xlu1 %798  ;;  %v933_v46 = vor.u32 1.1754944e-38, %v932_v37  ;;  %vm931_vm7 = vcmp.eq.f32.partialorder %v930_v40, 8.507059e+37 }
 0x227   : > { %v843_v32 = vadd.f32 %v1669_v15, %v799_v31 }
 0x229   : > { %v1340_v33 = vpop.eup %1339  ;;  %v1293_v2 = vmul.f32 -1.442695, %v843_v32 }
 0x22a   : > { %v1342_v34 = vpop.eup %1341  ;;  %v906_v35 = vadd.f32 1.0, %v1340_v33 }
 0x22b   : > { %v922_v36 = vmul.f32 %v1342_v34, %v905_v30  ;;  %1343 = vpow2.f32 %v1293_v2  ;;  %vm927_vm3 = vweird.f32 %v1342_v34 }
 0x22c   : > { %1345 = vrcp.f32 %v906_v35  ;;  %vm928_vm6 = vmor %vm926_vm4, %vm927_vm3  ;;  %v947_v52 = vand.u32 2147483648, %v906_v35  ;;  %v945_v55 = vand.u32 2147483647, %v906_v35  ;;  %vm941_vm9 = vweird.f32 %v906_v35 }
 0x22d   : > { %v923_v5 = vsub.f32 1.0, %v922_v36 }
 0x22e   : > { %v802_v38 = vpop.xlane.xlu1 %801  ;;  %v948_v61 = vor.u32 1.1754944e-38, %v947_v52  ;;  %vm946_vm11 = vcmp.eq.f32.partialorder %v945_v55, 8.507059e+37 }
 0x22f   : > { %v924_v39 = vmul.f32 %v1342_v34, %v923_v5  ;;  %v844_v41 = vadd.f32 %v1669_v15, %v802_v38 }
 0x231   : > { %v1344_v42 = vpop.eup %1343  ;;  %v925_v43 = vadd.f32 %v1342_v34, %v924_v39  ;;  %v1294_v44 = vmul.f32 -1.442695, %v844_v41 }
 0x232   : > { %v1346_v45 = vpop.eup %1345  ;;  %v907_v47 = vadd.f32 1.0, %v1344_v42 }
 0x233   : > { %v929_v48 = vsel %vm928_vm6, %v1342_v34, %v925_v43  ;;  %v937_v49 = vmul.f32 %v1346_v45, %v906_v35  ;;  %1347 = vpow2.f32 %v1294_v44  ;;  %vm942_vm8 = vweird.f32 %v1346_v45 }
 0x234   : > { %v934_v50 = vsel %vm931_vm7, %v933_v46, %v929_v48  ;;  %1349 = vrcp.f32 %v907_v47  ;;  %vm943_vm10 = vmor %vm941_vm9, %vm942_vm8  ;;  %v962_v4 = vand.u32 2147483648, %v907_v47  ;;  %v960_v8 = vand.u32 2147483647, %v907_v47 }
 0x235   : > { %1162 = vst.msk [vmem:[%s1685_s22] sm:$0xff] %vm1161_vm5, %v934_v50  ;;  %v938_v51 = vsub.f32 1.0, %v937_v49  ;;  %vm956_vm13 = vweird.f32 %v907_v47 }
 0x236   : > { %v805_v53 = vpop.xlane.xlu2 %804  ;;  %v963_v14 = vor.u32 1.1754944e-38, %v962_v4  ;;  %vm961_vm15 = vcmp.eq.f32.partialorder %v960_v8, 8.507059e+37 }
 0x237   : > { %v939_v54 = vmul.f32 %v1346_v45, %v938_v51  ;;  %v845_v56 = vadd.f32 %v1669_v15, %v805_v53 }
 0x239   : > { %v1348_v57 = vpop.eup %1347  ;;  %v940_v58 = vadd.f32 %v1346_v45, %v939_v54  ;;  %v1295_v59 = vmul.f32 -1.442695, %v845_v56 }
 0x23a   : > { %v1350_v60 = vpop.eup %1349  ;;  %v908_v62 = vadd.f32 1.0, %v1348_v57 }
 0x23b   : > { %v944_v63 = vsel %vm943_vm10, %v1346_v45, %v940_v58  ;;  %v952_v0 = vmul.f32 %v1350_v60, %v907_v47  ;;  %1351 = vpow2.f32 %v1295_v59  ;;  %vm957_vm12 = vweird.f32 %v1350_v60 }
 0x23c   : > { %v949_v1 = vsel %vm946_vm11, %v948_v61, %v944_v63  ;;  %1353 = vrcp.f32 %v908_v62  ;;  %vm958_vm14 = vmor %vm956_vm13, %vm957_vm12  ;;  %v977_v21 = vand.u32 2147483648, %v908_v62  ;;  %v975_v24 = vand.u32 2147483647, %v908_v62 }
 0x23d   : > { %1163 = vst.msk [vmem:[%s1685_s22 + $0x8] sm:$0xff] %vm1161_vm5, %v949_v1  ;;  %v953_v3 = vsub.f32 1.0, %v952_v0  ;;  %vm971_vm1 = vweird.f32 %v908_v62 }
 0x23e   : > { %v808_v6 = vpop.xlane.xlu2 %807  ;;  %v978_v30 = vor.u32 1.1754944e-38, %v977_v21  ;;  %vm976_vm3 = vcmp.eq.f32.partialorder %v975_v24, 8.507059e+37 }
 0x23f   : > { %v954_v7 = vmul.f32 %v1350_v60, %v953_v3  ;;  %v846_v9 = vadd.f32 %v1669_v15, %v808_v6 }
 0x241   : > { %v1352_v10 = vpop.eup %1351  ;;  %v955_v11 = vadd.f32 %v1350_v60, %v954_v7  ;;  %v1296_v12 = vmul.f32 -1.442695, %v846_v9 }
 0x242   : > { %v1354_v13 = vpop.eup %1353  ;;  %v909_v16 = vadd.f32 1.0, %v1352_v10 }
 0x243   : > { %v959_v17 = vsel %vm958_vm14, %v1350_v60, %v955_v11  ;;  %v967_v18 = vmul.f32 %v1354_v13, %v908_v62  ;;  %1355 = vpow2.f32 %v1296_v12  ;;  %vm972_vm0 = vweird.f32 %v1354_v13 }
 0x244   : > { %v964_v19 = vsel %vm961_vm15, %v963_v14, %v959_v17  ;;  %1357 = vrcp.f32 %v909_v16  ;;  %vm973_vm2 = vmor %vm971_vm1, %vm972_vm0  ;;  %v992_v35 = vand.u32 2147483648, %v909_v16  ;;  %v990_v37 = vand.u32 2147483647, %v909_v16 }
 0x245   : > { %1164 = vst.msk [vmem:[%s1685_s22 + $0x10] sm:$0xff] %vm1161_vm5, %v964_v19  ;;  %v968_v20 = vsub.f32 1.0, %v967_v18  ;;  %vm986_vm6 = vweird.f32 %v909_v16 }
 0x246   : > { %v811_v22 = vpop.xlane.xlu0 %810  ;;  %v993_v43 = vor.u32 1.1754944e-38, %v992_v35  ;;  %vm991_vm8 = vcmp.eq.f32.partialorder %v990_v37, 8.507059e+37 }
 0x247   : > { %v969_v23 = vmul.f32 %v1354_v13, %v968_v20  ;;  %v847_v25 = vadd.f32 %v1669_v15, %v811_v22 }
 0x249   : > { %v1356_v26 = vpop.eup %1355  ;;  %v970_v27 = vadd.f32 %v1354_v13, %v969_v23  ;;  %v1297_v28 = vmul.f32 -1.442695, %v847_v25 }
 0x24a   : > { %v1358_v29 = vpop.eup %1357  ;;  %v910_v31 = vadd.f32 1.0, %v1356_v26 }
 0x24b   : > { %v974_v32 = vsel %vm973_vm2, %v1354_v13, %v970_v27  ;;  %v982_v33 = vmul.f32 %v1358_v29, %v909_v16  ;;  %1359 = vpow2.f32 %v1297_v28  ;;  %vm987_vm4 = vweird.f32 %v1358_v29 }
 0x24c   : > { %v979_v2 = vsel %vm976_vm3, %v978_v30, %v974_v32  ;;  %1361 = vrcp.f32 %v910_v31  ;;  %vm988_vm7 = vmor %vm986_vm6, %vm987_vm4  ;;  %v1007_v49 = vand.u32 2147483648, %v910_v31  ;;  %v1005_v52 = vand.u32 2147483647, %v910_v31 }
 0x24d   : > { %1165 = vst.msk [vmem:[%s1685_s22 + $0x18] sm:$0xff] %vm1161_vm5, %v979_v2  ;;  %v983_v34 = vsub.f32 1.0, %v982_v33  ;;  %vm1001_vm10 = vweird.f32 %v910_v31 }
 0x24e   : > { %v814_v36 = vpop.xlane.xlu1 %813  ;;  %v1008_v58 = vor.u32 1.1754944e-38, %v1007_v49  ;;  %vm1006_vm12 = vcmp.eq.f32.partialorder %v1005_v52, 8.507059e+37 }
 0x24f   : > { %v984_v5 = vmul.f32 %v1358_v29, %v983_v34  ;;  %v848_v38 = vadd.f32 %v1669_v15, %v814_v36 }
 0x251   : > { %v1360_v39 = vpop.eup %1359  ;;  %v985_v40 = vadd.f32 %v1358_v29, %v984_v5  ;;  %v1298_v41 = vmul.f32 -1.442695, %v848_v38 }
 0x252   : > { %v1362_v42 = vpop.eup %1361  ;;  %v911_v44 = vadd.f32 1.0, %v1360_v39 }
 0x253   : > { %v989_v45 = vsel %vm988_vm7, %v1358_v29, %v985_v40  ;;  %v997_v46 = vmul.f32 %v1362_v42, %v910_v31  ;;  %1363 = vpow2.f32 %v1298_v41  ;;  %vm1002_vm9 = vweird.f32 %v1362_v42 }
 0x254   : > { %v994_v47 = vsel %vm991_vm8, %v993_v43, %v989_v45  ;;  %1365 = vrcp.f32 %v911_v44  ;;  %vm1003_vm11 = vmor %vm1001_vm10, %vm1002_vm9  ;;  %v1022_v0 = vand.u32 2147483648, %v911_v44  ;;  %v1020_v4 = vand.u32 2147483647, %v911_v44 }
 0x255   : > { %1166 = vst.msk [vmem:[%s1685_s22 + $0x20] sm:$0xff] %vm1161_vm5, %v994_v47  ;;  %v998_v48 = vsub.f32 1.0, %v997_v46  ;;  %vm1016_vm14 = vweird.f32 %v911_v44 }
 0x256   : > { %v817_v50 = vpop.xlane.xlu2 %816  ;;  %v1023_v11 = vor.u32 1.1754944e-38, %v1022_v0  ;;  %vm1021_vm0 = vcmp.eq.f32.partialorder %v1020_v4, 8.507059e+37 }
 0x257   : > { %v999_v51 = vmul.f32 %v1362_v42, %v998_v48  ;;  %v849_v53 = vadd.f32 %v1669_v15, %v817_v50 }
 0x259   : > { %v1364_v54 = vpop.eup %1363  ;;  %v1000_v55 = vadd.f32 %v1362_v42, %v999_v51  ;;  %v1299_v56 = vmul.f32 -1.442695, %v849_v53 }
 0x25a   : > { %v1366_v57 = vpop.eup %1365  ;;  %v912_v59 = vadd.f32 1.0, %v1364_v54 }
 0x25b   : > { %v1004_v60 = vsel %vm1003_vm11, %v1362_v42, %v1000_v55  ;;  %v1012_v61 = vmul.f32 %v1366_v57, %v911_v44  ;;  %1367 = vpow2.f32 %v1299_v56  ;;  %vm1017_vm13 = vweird.f32 %v1366_v57 }
 0x25c   : > { %v1009_v62 = vsel %vm1006_vm12, %v1008_v58, %v1004_v60  ;;  %1369 = vrcp.f32 %v912_v59  ;;  %vm1018_vm15 = vmor %vm1016_vm14, %vm1017_vm13  ;;  %v1037_v18 = vand.u32 2147483648, %v912_v59  ;;  %v1035_v21 = vand.u32 2147483647, %v912_v59 }
 0x25d   : > { %1167 = vst.msk [vmem:[%s1685_s22 + $0x28] sm:$0xff] %vm1161_vm5, %v1009_v62  ;;  %v1013_v63 = vsub.f32 1.0, %v1012_v61  ;;  %vm1031_vm2 = vweird.f32 %v912_v59 }
 0x25e   : > { %v820_v1 = vpop.xlane.xlu0 %819  ;;  %v1038_v27 = vor.u32 1.1754944e-38, %v1037_v18  ;;  %vm1036_vm4 = vcmp.eq.f32.partialorder %v1035_v21, 8.507059e+37 }
 0x25f   : > { %v1014_v3 = vmul.f32 %v1366_v57, %v1013_v63  ;;  %v850_v6 = vadd.f32 %v1669_v15, %v820_v1 }
 0x261   : > { %v1368_v7 = vpop.eup %1367  ;;  %v1015_v8 = vadd.f32 %v1366_v57, %v1014_v3  ;;  %v1300_v9 = vmul.f32 -1.442695, %v850_v6 }
 0x262   : > { %v1370_v10 = vpop.eup %1369  ;;  %v913_v12 = vadd.f32 1.0, %v1368_v7 }
 0x263   : > { %v1019_v13 = vsel %vm1018_vm15, %v1366_v57, %v1015_v8  ;;  %v1027_v14 = vmul.f32 %v1370_v10, %v912_v59  ;;  %1371 = vpow2.f32 %v1300_v9  ;;  %vm1032_vm1 = vweird.f32 %v1370_v10 }
 0x264   : > { %v1024_v16 = vsel %vm1021_vm0, %v1023_v11, %v1019_v13  ;;  %1373 = vrcp.f32 %v913_v12  ;;  %vm1033_vm3 = vmor %vm1031_vm2, %vm1032_vm1  ;;  %v1052_v33 = vand.u32 2147483648, %v913_v12  ;;  %v1050_v35 = vand.u32 2147483647, %v913_v12 }
 0x265   : > { %1168 = vst.msk [vmem:[%s1685_s22 + $0x30] sm:$0xff] %vm1161_vm5, %v1024_v16  ;;  %v1028_v17 = vsub.f32 1.0, %v1027_v14  ;;  %vm1046_vm7 = vweird.f32 %v913_v12 }
 0x266   : > { %v823_v19 = vpop.xlane.xlu1 %822  ;;  %v1053_v40 = vor.u32 1.1754944e-38, %v1052_v33  ;;  %vm1051_vm9 = vcmp.eq.f32.partialorder %v1050_v35, 8.507059e+37 }
 0x267   : > { %v1029_v20 = vmul.f32 %v1370_v10, %v1028_v17  ;;  %v851_v22 = vadd.f32 %v1669_v15, %v823_v19 }
 0x269   : > { %v1372_v23 = vpop.eup %1371  ;;  %v1030_v24 = vadd.f32 %v1370_v10, %v1029_v20  ;;  %v1301_v25 = vmul.f32 -1.442695, %v851_v22 }
 0x26a   : > { %v1374_v26 = vpop.eup %1373  ;;  %v914_v28 = vadd.f32 1.0, %v1372_v23 }
 0x26b   : > { %v1034_v29 = vsel %vm1033_vm3, %v1370_v10, %v1030_v24  ;;  %v1042_v30 = vmul.f32 %v1374_v26, %v913_v12  ;;  %1375 = vpow2.f32 %v1301_v25  ;;  %vm1047_vm6 = vweird.f32 %v1374_v26 }
 0x26c   : > { %v1039_v31 = vsel %vm1036_vm4, %v1038_v27, %v1034_v29  ;;  %1377 = vrcp.f32 %v914_v28  ;;  %vm1048_vm8 = vmor %vm1046_vm7, %vm1047_vm6  ;;  %v1067_v46 = vand.u32 2147483648, %v914_v28  ;;  %v1065_v48 = vand.u32 2147483647, %v914_v28 }
 0x26d   : > { %1169 = vst.msk [vmem:[%s1685_s22 + $0x38] sm:$0xff] %vm1161_vm5, %v1039_v31  ;;  %v1043_v32 = vsub.f32 1.0, %v1042_v30  ;;  %vm1061_vm11 = vweird.f32 %v914_v28 }
 0x26e   : > { %v826_v2 = vpop.xlane.xlu2 %825  ;;  %v1068_v52 = vor.u32 1.1754944e-38, %v1067_v46  ;;  %vm1066_vm13 = vcmp.eq.f32.partialorder %v1065_v48, 8.507059e+37 }
 0x26f   : > { %v1044_v34 = vmul.f32 %v1374_v26, %v1043_v32  ;;  %v852_v36 = vadd.f32 %v1669_v15, %v826_v2 }
 0x271   : > { %v1376_v5 = vpop.eup %1375  ;;  %v1045_v37 = vadd.f32 %v1374_v26, %v1044_v34  ;;  %v1302_v38 = vmul.f32 -1.442695, %v852_v36 }
 0x272   : > { %v1378_v39 = vpop.eup %1377  ;;  %v915_v41 = vadd.f32 1.0, %v1376_v5 }
 0x273   : > { %v1049_v42 = vsel %vm1048_vm8, %v1374_v26, %v1045_v37  ;;  %v1057_v43 = vmul.f32 %v1378_v39, %v914_v28  ;;  %1379 = vpow2.f32 %v1302_v38  ;;  %vm1062_vm10 = vweird.f32 %v1378_v39 }
 0x274   : > { %v1054_v44 = vsel %vm1051_vm9, %v1053_v40, %v1049_v42  ;;  %1381 = vrcp.f32 %v915_v41  ;;  %vm1063_vm12 = vmor %vm1061_vm11, %vm1062_vm10  ;;  %v1082_v60 = vand.u32 2147483648, %v915_v41  ;;  %v1080_v62 = vand.u32 2147483647, %v915_v41 }
 0x275   : > { %1170 = vst.msk [vmem:[%s1685_s22 + $0x40] sm:$0xff] %vm1161_vm5, %v1054_v44  ;;  %v1058_v45 = vsub.f32 1.0, %v1057_v43  ;;  %vm1076_vm15 = vweird.f32 %v915_v41 }
 0x276   : > { %v1083_v3 = vor.u32 1.1754944e-38, %v1082_v60  ;;  %vm1081_vm1 = vcmp.eq.f32.partialorder %v1080_v62, 8.507059e+37 }
 0x277   : > { %v1059_v47 = vmul.f32 %v1378_v39, %v1058_v45 }
 0x279   : > { %v1380_v49 = vpop.eup %1379  ;;  %v1060_v50 = vadd.f32 %v1378_v39, %v1059_v47 }
 0x27a   : > { %v1382_v51 = vpop.eup %1381  ;;  %v916_v53 = vadd.f32 1.0, %v1380_v49 }
 0x27b   : > { %v1064_v54 = vsel %vm1063_vm12, %v1378_v39, %v1060_v50  ;;  %v1072_v55 = vmul.f32 %v1382_v51, %v915_v41  ;;  %vm1077_vm14 = vweird.f32 %v1382_v51 }
 0x27c   : > { %v1069_v56 = vsel %vm1066_vm13, %v1068_v52, %v1064_v54  ;;  %1383 = vrcp.f32 %v916_v53  ;;  %v829_v57 = vpop.xlane.xlu0 %828  ;;  %vm1078_vm0 = vmor %vm1076_vm15, %vm1077_vm14  ;;  %v1097_v11 = vand.u32 2147483648, %v916_v53  ;;  %v1095_v14 = vand.u32 2147483647, %v916_v53 }
 0x27d   : > { %1171 = vst.msk [vmem:[%s1685_s22 + $0x48] sm:$0xff] %vm1161_vm5, %v1069_v56  ;;  %v1073_v58 = vsub.f32 1.0, %v1072_v55  ;;  %v853_v59 = vadd.f32 %v1669_v15, %v829_v57  ;;  %vm1091_vm3 = vweird.f32 %v916_v53 }
 0x27e   : > { %v1098_v19 = vor.u32 1.1754944e-38, %v1097_v11  ;;  %vm1096_vm6 = vcmp.eq.f32.partialorder %v1095_v14, 8.507059e+37 }
 0x27f   : > { %v1074_v61 = vmul.f32 %v1382_v51, %v1073_v58  ;;  %v1303_v63 = vmul.f32 -1.442695, %v853_v59 }
 0x281   : > { %v1075_v0 = vadd.f32 %v1382_v51, %v1074_v61  ;;  %1385 = vpow2.f32 %v1303_v63 }
 0x282   : > { %v1384_v1 = vpop.eup %1383 }
 0x283   : > { %v1079_v4 = vsel %vm1078_vm0, %v1382_v51, %v1075_v0  ;;  %v1087_v6 = vmul.f32 %v1384_v1, %v916_v53  ;;  %vm1092_vm2 = vweird.f32 %v1384_v1 }
 0x284   : > { %v1084_v7 = vsel %vm1081_vm1, %v1083_v3, %v1079_v4  ;;  %v832_v8 = vpop.xlane.xlu1 %831  ;;  %vm1093_vm4 = vmor %vm1091_vm3, %vm1092_vm2 }
 0x285   : > { %1172 = vst.msk [vmem:[%s1685_s22 + $0x50] sm:$0xff] %vm1161_vm5, %v1084_v7  ;;  %v1088_v9 = vsub.f32 1.0, %v1087_v6  ;;  %v854_v10 = vadd.f32 %v1669_v15, %v832_v8 }
 0x287   : > { %v1386_v12 = vpop.eup %1385  ;;  %v1089_v13 = vmul.f32 %v1384_v1, %v1088_v9  ;;  %v1304_v16 = vmul.f32 -1.442695, %v854_v10 }
 0x288   : > { %v917_v17 = vadd.f32 1.0, %v1386_v12 }
 0x289   : > { %v1090_v18 = vadd.f32 %v1384_v1, %v1089_v13  ;;  %1387 = vpow2.f32 %v1304_v16 }
 0x28a   : > { %1389 = vrcp.f32 %v917_v17  ;;  %v1112_v30 = vand.u32 2147483648, %v917_v17  ;;  %v1110_v33 = vand.u32 2147483647, %v917_v17  ;;  %vm1106_vm8 = vweird.f32 %v917_v17 }
 0x28b   : > { %v1094_v20 = vsel %vm1093_vm4, %v1384_v1, %v1090_v18 }
 0x28c   : > { %v1099_v21 = vsel %vm1096_vm6, %v1098_v19, %v1094_v20  ;;  %v835_v22 = vpop.xlane.xlu2 %834  ;;  %v1113_v37 = vor.u32 1.1754944e-38, %v1112_v30  ;;  %vm1111_vm10 = vcmp.eq.f32.partialorder %v1110_v33, 8.507059e+37 }
 0x28d   : > { %1173 = vst.msk [vmem:[%s1685_s22 + $0x58] sm:$0xff] %vm1161_vm5, %v1099_v21  ;;  %v855_v23 = vadd.f32 %v1669_v15, %v835_v22 }
 0x28f   : > { %v1388_v24 = vpop.eup %1387  ;;  %v1305_v25 = vmul.f32 -1.442695, %v855_v23 }
 0x290   : > { %v1390_v26 = vpop.eup %1389  ;;  %v918_v27 = vadd.f32 1.0, %v1388_v24 }
 0x291   : > { %v1102_v28 = vmul.f32 %v1390_v26, %v917_v17  ;;  %1391 = vpow2.f32 %v1305_v25  ;;  %vm1107_vm7 = vweird.f32 %v1390_v26 }
 0x292   : > { %1393 = vrcp.f32 %v918_v27  ;;  %vm1108_vm9 = vmor %vm1106_vm8, %vm1107_vm7  ;;  %v1127_v43 = vand.u32 2147483648, %v918_v27  ;;  %v1125_v44 = vand.u32 2147483647, %v918_v27  ;;  %vm1121_vm12 = vweird.f32 %v918_v27 }
 0x293   : > { %v1103_v29 = vsub.f32 1.0, %v1102_v28 }
 0x294   : > { %v838_v31 = vpop.xlane.xlu0 %837  ;;  %v1128_v48 = vor.u32 1.1754944e-38, %v1127_v43  ;;  %vm1126_vm14 = vcmp.eq.f32.partialorder %v1125_v44, 8.507059e+37 }
 0x295   : > { %v1104_v32 = vmul.f32 %v1390_v26, %v1103_v29  ;;  %v856_v2 = vadd.f32 %v1669_v15, %v838_v31 }
 0x297   : > { %v1392_v34 = vpop.eup %1391  ;;  %v1105_v35 = vadd.f32 %v1390_v26, %v1104_v32  ;;  %v1306_v36 = vmul.f32 -1.442695, %v856_v2 }
 0x298   : > { %v1394_v5 = vpop.eup %1393  ;;  %v919_v38 = vadd.f32 1.0, %v1392_v34 }
 0x299   : > { %v1109_v39 = vsel %vm1108_vm9, %v1390_v26, %v1105_v35  ;;  %v1117_v40 = vmul.f32 %v1394_v5, %v918_v27  ;;  %1395 = vpow2.f32 %v1306_v36  ;;  %vm1122_vm11 = vweird.f32 %v1394_v5 }
 0x29a   : > { %v1114_v41 = vsel %vm1111_vm10, %v1113_v37, %v1109_v39  ;;  %1397 = vrcp.f32 %v919_v38  ;;  %vm1123_vm13 = vmor %vm1121_vm12, %vm1122_vm11  ;;  %v1142_v54 = vand.u32 2147483648, %v919_v38  ;;  %v1140_v56 = vand.u32 2147483647, %v919_v38 }
 0x29b   : > { %1174 = vst.msk [vmem:[%s1685_s22 + $0x60] sm:$0xff] %vm1161_vm5, %v1114_v41  ;;  %v1118_v42 = vsub.f32 1.0, %v1117_v40  ;;  %vm1136_vm0 = vweird.f32 %v919_v38 }
 0x29c   : > { %v1143_v59 = vor.u32 1.1754944e-38, %v1142_v54  ;;  %vm1141_vm2 = vcmp.eq.f32.partialorder %v1140_v56, 8.507059e+37 }
 0x29d   : > { %v1119_v15 = vmul.f32 %v1394_v5, %v1118_v42 }
 0x29f   : > { %v1396_v45 = vpop.eup %1395  ;;  %v1120_v46 = vadd.f32 %v1394_v5, %v1119_v15 }
 0x2a0   : > { %v1398_v47 = vpop.eup %1397  ;;  %v920_v49 = vadd.f32 1.0, %v1396_v45 }
 0x2a1   : > { %v1124_v50 = vsel %vm1123_vm13, %v1394_v5, %v1120_v46  ;;  %v1132_v51 = vmul.f32 %v1398_v47, %v919_v38  ;;  %vm1137_vm15 = vweird.f32 %v1398_v47 }
 0x2a2   : > { %v1129_v52 = vsel %vm1126_vm14, %v1128_v48, %v1124_v50  ;;  %1399 = vrcp.f32 %v920_v49  ;;  %vm1138_vm1 = vmor %vm1136_vm0, %vm1137_vm15  ;;  %v1157_v0 = vand.u32 2147483648, %v920_v49  ;;  %v1155_v3 = vand.u32 2147483647, %v920_v49 }
 0x2a3   : > { %1175 = vst.msk [vmem:[%s1685_s22 + $0x68] sm:$0xff] %vm1161_vm5, %v1129_v52  ;;  %v1133_v53 = vsub.f32 1.0, %v1132_v51  ;;  %vm1151_vm4 = vweird.f32 %v920_v49 }
 0x2a4   : > { %v1158_v6 = vor.u32 1.1754944e-38, %v1157_v0  ;;  %vm1156_vm7 = vcmp.eq.f32.partialorder %v1155_v3, 8.507059e+37 }
 0x2a5   : > { %v1134_v55 = vmul.f32 %v1398_v47, %v1133_v53 }
 0x2a7   : > { %v1135_v57 = vadd.f32 %v1398_v47, %v1134_v55 }
 0x2a8   : > { %v1400_v58 = vpop.eup %1399 }
 0x2a9   : > { %v1139_v60 = vsel %vm1138_vm1, %v1398_v47, %v1135_v57  ;;  %v1147_v61 = vmul.f32 %v1400_v58, %v920_v49  ;;  %vm1152_vm3 = vweird.f32 %v1400_v58 }
 0x2aa   : > { %v1144_v62 = vsel %vm1141_vm2, %v1143_v59, %v1139_v60  ;;  %vm1153_vm6 = vmor %vm1151_vm4, %vm1152_vm3 }
 0x2ab   : > { %1176 = vst.msk [vmem:[%s1685_s22 + $0x70] sm:$0xff] %vm1161_vm5, %v1144_v62  ;;  %v1148_v63 = vsub.f32 1.0, %v1147_v61 }
 0x2ad   : > { %v1149_v1 = vmul.f32 %v1400_v58, %v1148_v63 }
 0x2af   : > { %v1150_v4 = vadd.f32 %v1400_v58, %v1149_v1 }
 0x2b1   : > { %v1154_v7 = vsel %vm1153_vm6, %v1400_v58, %v1150_v4 }
 0x2b2   : > { %v1159_v8 = vsel %vm1156_vm7, %v1158_v6, %v1154_v7 }
 0x2b3   : > { %1177 = vst.msk [vmem:[%s1685_s22 + $0x78] sm:$0xff] %vm1161_vm5, %v1159_v8 }
 0x2b4 PF: > { %s20_s11 = sadd.s32 1, %s1407_s11  }
 0x2b5   : > { %p17_p4 = scmp.ge.s32.totalorder %s20_s11, 5  }
 0x2b7   :  { %19 = sbr.rel (!%p17_p4) target bundleno = 2 (0x2), region = 86 }

</bundles_post_ra>
